<compile_context>
chip_gen: v5e
topology: v5e:2x2
jax: 0.10.0
libtpu: 0.0.40
codegen_flags: <defaults>
</compile_context>

<pallas_src>
import functools
import math

import jax
import jax.numpy as jnp
from jax.experimental import pallas as pl
from jax.experimental.pallas import tpu as pltpu


# ----------------------------------------------------------------------------
# Small helpers
# ----------------------------------------------------------------------------
def _cdiv(a, b):
    return -(-a // b)


def _round_up(a, m):
    return _cdiv(a, m) * m


def _get_softmax_dim(ndim):
    # Mirrors torch.nn.functional._get_softmax_dim for dim=None.
    return 0 if ndim in (0, 1, 3) else 1


def _chip_config():
    """Return (vmem_limit_bytes, dual_tensorcore) for the local TPU."""
    vmem_cap = 128 * 1024 * 1024
    try:
        info = pltpu.get_tpu_info()
        vmem_cap = int(getattr(info, "vmem_capacity_bytes", vmem_cap))
    except Exception:
        pass
    if vmem_cap <= 64 * 1024 * 1024:
        # v7x-class part: 64 MiB physical VMEM per TensorCore, 2 TCs per chip
        # sharing HBM -> keep scoped limit well under physical and prefer an
        # even grid-step count.
        return min(48 * 1024 * 1024, (vmem_cap * 3) // 4), True
    # v5e / v6e: 128 MiB physical VMEM, single TensorCore per chip.
    return 64 * 1024 * 1024, False


def _has_bf16_vector_units():
    # v6e and later have bf16-capable VPU/EUP; v5e (and older) do not.
    try:
        kind = jax.devices()[0].device_kind.lower()
    except Exception:
        return False
    return ("v6" in kind) or ("v7" in kind)


def _budget_padded_elems(vmem_limit_bytes, io_itemsize, compute_itemsize):
    """Max padded elements per tile given the full per-step VMEM footprint.

    Footprint per grid step (in padded elements):
      2 double-buffered input tiles + 2 double-buffered output tiles in the
      I/O dtype, plus ~2 live full-tile temporaries in the compute dtype
      (the up-cast x and e, which must stay live across the sum).
    """
    bytes_per_elem = 4 * io_itemsize + 2 * compute_itemsize
    usable = int(vmem_limit_bytes * 0.6)  # headroom for compiler scratch etc.
    return max(1024, usable // bytes_per_elem)


def _make_even_steps(extent, tile, multiple):
    """Shrink `tile` (to a multiple of `multiple`) so cdiv(extent, tile) is
    even; return the original tile if not possible."""
    steps = _cdiv(extent, tile)
    if steps % 2 == 0:
        return tile
    cand = _round_up(_cdiv(extent, steps + 1), multiple)
    if 0 < cand < extent and _cdiv(extent, cand) % 2 == 0:
        return cand
    return tile


# ----------------------------------------------------------------------------
# Kernels
# ----------------------------------------------------------------------------
def _softmax_sublane_kernel(x_ref, o_ref, *, min_sub_out, compute_dtype):
    # Block: (tile_pre, C, tile_post); softmax over axis=-2 (sublane axis),
    # large post extent stays lane-dense.
    x = x_ref[...].astype(compute_dtype)
    m = jnp.max(x, axis=-2, keepdims=True)
    shifted = x - m                                     # <= 0 by construction
    if min_sub_out is not None:
        shifted = jnp.maximum(shifted, min_sub_out)     # SegmentLUT input range
    e = jnp.exp(shifted)
    s = jnp.sum(e, axis=-2, keepdims=True, dtype=jnp.float32)
    r = (1.0 / s).astype(compute_dtype)                 # exact; per-row only
    o_ref[...] = (e * r).astype(o_ref.dtype)


def _softmax_lane_kernel(x_ref, o_ref, *, min_sub_out, compute_dtype):
    # Block: (tile_rows, C); softmax over axis=-1 (lane axis).  Used when the
    # softmax axis is innermost (post == 1).
    x = x_ref[...].astype(compute_dtype)
    m = jnp.max(x, axis=-1, keepdims=True)
    shifted = x - m
    if min_sub_out is not None:
        shifted = jnp.maximum(shifted, min_sub_out)
    e = jnp.exp(shifted)
    s = jnp.sum(e, axis=-1, keepdims=True, dtype=jnp.float32)
    r = (1.0 / s).astype(compute_dtype)
    o_ref[...] = (e * r).astype(o_ref.dtype)


# ----------------------------------------------------------------------------
# Wrapper
# ----------------------------------------------------------------------------
def segment_lut_softmax(x, dim=None, min_sub_out=-12.0):
    """Pallas-backed forward of SegmentLUTSoftmax (checkpoint level 0)."""
    if x.ndim == 0:
        return jnp.ones_like(x)
    if dim is None:
        dim = _get_softmax_dim(x.ndim)
    if dim < 0:
        dim += x.ndim

    shape = x.shape
    C = int(shape[dim])
    pre = int(math.prod(shape[:dim])) if dim > 0 else 1
    post = int(math.prod(shape[dim + 1:])) if dim + 1 < x.ndim else 1

    io_itemsize = jnp.dtype(x.dtype).itemsize
    compute_dtype = (jnp.bfloat16
                     if (x.dtype == jnp.bfloat16 and _has_bf16_vector_units())
                     else jnp.float32)
    compute_itemsize = jnp.dtype(compute_dtype).itemsize
    min_sub_out = None if min_sub_out is None else float(min_sub_out)

    vmem_limit, dual_tc = _chip_config()
    budget = _budget_padded_elems(vmem_limit, io_itemsize, compute_itemsize)
    sub_mult = max(8, 32 // io_itemsize)      # sublane padding multiple (dtype)

    compiler_kwargs = dict(vmem_limit_bytes=vmem_limit)

    # NOTE: if strided / short-row DMAs remain (tile_post < post), input depth
    # could be raised with pipeline_mode=pl.Buffered(3) and swept; full-post
    # tiles are preferred below so the default double-buffering is kept.

    if post == 1:
        # ---------------- softmax over the innermost axis: lane reduction ----
        rows = pre
        x2d = x.reshape(rows, C)
        c_pad = _round_up(C, 128)             # lane padding for the block

        max_rows = max(sub_mult, (budget // c_pad) // sub_mult * sub_mult)
        tile_rows = rows if max_rows >= rows else max_rows
        if dual_tc:
            tile_rows = _make_even_steps(rows, tile_rows, sub_mult)
        grid = (_cdiv(rows, tile_rows),)

        kernel = functools.partial(_softmax_lane_kernel,
                                   min_sub_out=min_sub_out,
                                   compute_dtype=compute_dtype)
        out2d = pl.pallas_call(
            kernel,
            out_shape=jax.ShapeDtypeStruct((rows, C), x.dtype),
            grid_spec=pltpu.PrefetchScalarGridSpec(
                num_scalar_prefetch=0,
                grid=grid,
                in_specs=[pl.BlockSpec((tile_rows, C), lambda i: (i, 0))],
                out_specs=pl.BlockSpec((tile_rows, C), lambda i: (i, 0)),
            ),
            compiler_params=pltpu.CompilerParams(
                dimension_semantics=("parallel",), **compiler_kwargs),
        )(x2d)
        return out2d.reshape(shape)

    # -------------------- general case: sublane reduction, lane-dense --------
    # Contiguous view (pre, C, post): reduction over C (sublanes), post on
    # lanes. For NCHW / dim=1 this is (N, C, H*W) with no transposes.
    x3d = x.reshape(pre, C, post)
    c_pad = _round_up(C, sub_mult)
    post_pad_full = _round_up(post, 128)

    if c_pad * post_pad_full <= budget:
        # Full-post tiles: long contiguous DMA rows.
        tile_post = post
        tile_pre = max(1, min(pre, budget // (c_pad * post_pad_full)))
    else:
        tile_pre = 1
        if post >= 128:
            # 128-multiple lane tile; ragged edge block handled by cdiv.
            chunks = max(1, budget // (c_pad * 128))
            tile_post = min(128 * chunks, (post // 128) * 128)
        else:
            # post < 128: full extent is the only legal lane block.
            tile_post = post

    if dual_tc:
        if (_cdiv(pre, tile_pre) * _cdiv(post, tile_post)) % 2 == 1:
            new_tile_pre = _make_even_steps(pre, tile_pre, 1)
            if _cdiv(pre, new_tile_pre) % 2 == 0:
                tile_pre = new_tile_pre
            elif post >= 128:
                tile_post = _make_even_steps(post, tile_post, 128)

    grid = (_cdiv(pre, tile_pre), _cdiv(post, tile_post))

    kernel = functools.partial(_softmax_sublane_kernel,
                               min_sub_out=min_sub_out,
                               compute_dtype=compute_dtype)
    out3d = pl.pallas_call(
        kernel,
        out_shape=jax.ShapeDtypeStruct((pre, C, post), x.dtype),
        grid_spec=pltpu.PrefetchScalarGridSpec(
            num_scalar_prefetch=0,
            grid=grid,
            in_specs=[pl.BlockSpec((tile_pre, C, tile_post),
                                   lambda i, j: (i, 0, j))],
            out_specs=pl.BlockSpec((tile_pre, C, tile_post),
                                   lambda i, j: (i, 0, j)),
        ),
        compiler_params=pltpu.CompilerParams(
            dimension_semantics=("parallel", "parallel"), **compiler_kwargs),
    )(x3d)
    return out3d.reshape(shape)


# ----------------------------------------------------------------------------
# Self-test
# ----------------------------------------------------------------------------
def _ref_softmax(x, axis, min_sub_out=-12.0):
    xm = x.astype(jnp.float32) - jnp.max(x.astype(jnp.float32), axis=axis,
                                         keepdims=True)
    xm = jnp.maximum(xm, min_sub_out)
    e = jnp.exp(xm)
    return (e / jnp.sum(e, axis=axis, keepdims=True)).astype(x.dtype)


if __name__ == "__main__":
    key = jax.random.PRNGKey(0)

    # NCHW input, as the PyTorch module expects (batch=2, channels=4, 16x16).
    # dim=None -> dim=1 (channels) for 4-D input -> sublane-reduction path.
    x = jax.random.normal(key, (2, 4, 16, 16), dtype=jnp.float32) * 3.0
    out = jax.block_until_ready(segment_lut_softmax(x))
    ref = _ref_softmax(x, axis=1)

    assert out.shape == x.shape and out.dtype == x.dtype
    assert jnp.allclose(out, ref, atol=2e-5, rtol=2e-5)
    assert jnp.allclose(jnp.sum(out, axis=1), 1.0, atol=1e-4)

    # Innermost-axis (lane-reduction) path, e.g. attention scores of shape
    # (batch=2, seq=8, hidden=32) with dim=-1.
    key2 = jax.random.PRNGKey(0)
    x2 = jax.random.normal(key2, (2, 8, 32), dtype=jnp.float32) * 3.0
    out2 = jax.block_until_ready(segment_lut_softmax(x2, dim=-1))
    ref2 = _ref_softmax(x2, axis=-1)

    assert out2.shape == x2.shape and out2.dtype == x2.dtype
    assert jnp.allclose(out2, ref2, atol=2e-5, rtol=2e-5)
    assert jnp.allclose(jnp.sum(out2, axis=-1), 1.0, atol=1e-4)

    print("KERNEL_OK")
</pallas_src>

<mosaic_0001>
module attributes {stable_mosaic.version = 11 : i64} {
  func.func @_softmax_sublane_kernel(%arg0: i32, %arg1: i32, %arg2: memref<2x4x256xf32, #tpu.memory_space<vmem>>, %arg3: memref<2x4x256xf32, #tpu.memory_space<vmem>>) attributes {dimension_semantics = [#tpu.dimension_semantics<parallel>, #tpu.dimension_semantics<parallel>], iteration_bounds = array<i64: 1, 1>, scalar_prefetch = 0 : i64, scratch_operands = 0 : i64, tpu.core_type = #tpu.core_type<tc>, window_params = [{transform_indices = @transform_0, window_bounds = array<i64: 2, 4, 256>}, {transform_indices = @transform_1, window_bounds = array<i64: 2, 4, 256>}]} {
    %c0 = arith.constant 0 : index
    %c0_0 = arith.constant 0 : index
    %c0_1 = arith.constant 0 : index
    %0 = vector.load %arg2[%c0, %c0_0, %c0_1] : memref<2x4x256xf32, #tpu.memory_space<vmem>>, vector<2x4x256xf32>
    %cst = arith.constant dense<0xFF800000> : vector<2x256xf32>
    %1 = vector.multi_reduction <maximumf>, %0, %cst [1] : vector<2x4x256xf32> to vector<2x256xf32>
    %2 = vector.shape_cast %1 : vector<2x256xf32> to vector<2x1x256xf32>
    %3 = vector.broadcast %2 : vector<2x1x256xf32> to vector<2x4x256xf32>
    %4 = arith.subf %0, %3 : vector<2x4x256xf32>
    %cst_2 = arith.constant -1.200000e+01 : f32
    %5 = vector.broadcast %cst_2 : f32 to vector<2x4x256xf32>
    %6 = arith.maximumf %4, %5 : vector<2x4x256xf32>
    %7 = math.exp %6 : vector<2x4x256xf32>
    %cst_3 = arith.constant dense<0.000000e+00> : vector<2x256xf32>
    %8 = vector.multi_reduction <add>, %7, %cst_3 [1] : vector<2x4x256xf32> to vector<2x256xf32>
    %9 = vector.shape_cast %8 : vector<2x256xf32> to vector<2x1x256xf32>
    %cst_4 = arith.constant 1.000000e+00 : f32
    %10 = vector.broadcast %cst_4 : f32 to vector<2x1x256xf32>
    %11 = arith.divf %10, %9 : vector<2x1x256xf32>
    %12 = vector.broadcast %11 : vector<2x1x256xf32> to vector<2x4x256xf32>
    %13 = arith.mulf %7, %12 : vector<2x4x256xf32>
    %c0_5 = arith.constant 0 : index
    %c0_6 = arith.constant 0 : index
    %c0_7 = arith.constant 0 : index
    %14 = vector.load %arg3[%c0_5, %c0_6, %c0_7] : memref<2x4x256xf32, #tpu.memory_space<vmem>>, vector<2x4x256xf32>
    tpu.vector_store %arg3[%c0_5, %c0_6, %c0_7], %13 {strides = array<i32>} : memref<2x4x256xf32, #tpu.memory_space<vmem>>, vector<2x4x256xf32>,
    return
  }
  func.func @transform_0(%arg0: i32, %arg1: i32) -> (i32, i32, i32) {
    %c0_i32 = arith.constant 0 : i32
    %c0_i32_0 = arith.constant 0 : i32
    return %arg0, %c0_i32, %arg1 : i32, i32, i32
  }
  func.func @transform_1(%arg0: i32, %arg1: i32) -> (i32, i32, i32) {
    %c0_i32 = arith.constant 0 : i32
    %c0_i32_0 = arith.constant 0 : i32
    return %arg0, %c0_i32, %arg1 : i32, i32, i32
  }
}

</mosaic_0001>

<bundles_post_ra>
// kernel: tpu_custom_call.1
= control target key start
LH: loop header
LB: loop body
LE: loop exit
PB: predicated region body
PF: predicated region fallthrough
CT: control target
= control target key end

     0   :  { %6 = vsyncpa [#allocation3], 0  ;;  %s353_s0 = inlined_call_operand.hbm [shape: f32[2,4,256], index: 0, kind: input, shape index: {}]   ;;  %s354_s1 = inlined_call_operand.hbm [shape: f32[2,4,256], index: 1, kind: output, shape index: {}]  }
   0x1   :  { %7 = vsyncpa [#allocation4], 0  ;;  %s12_s8 = sshll.u32 %s353_s0, 4  ;;  %s289_s9 = smov [#allocation2]   ;;  %s13_s8 = int_to_ptr.hbm [resolvable:$true] %s12_s8 }
   0x2   :  { %s14_s10 = sshll.u32 %s289_s9, 4  ;;  %s290_s11 = smov 128   ;;  %s15_s10 = int_to_ptr.vmem [resolvable:$true] %s14_s10 }
   0x3   :  { %s291_s12 = smov 8  }
   0x4   :  { %20 = dma.hbm_to_vmem [thread:$0]  %s13_s8, 256, %s15_s10, [#allocation3], %s290_s11, %s290_s11, %s291_s12  }
   0x5   :  { %285 = dma.done.wait [#allocation3], 256  }
   0x6   :  { %286 = vsyncadd [#allocation3], 4294967040  ;;  %v25_v0 = vld [vmem:[#allocation2] sm:$0xff]  ;;  %v26_v1 = vld [vmem:[#allocation2 + $0x8] sm:$0xff]  ;;  %vm40_vm0 = vcmask 1043456   ;;  %s292_s0 = smov [#allocation5]  }
   0x7   :  { %29 = vst [vmem:[#allocation1] ss:$2 sm:$0xff] %v25_v0  ;;  %s206_s13 = sshll.u32 %s292_s0, 4  ;;  %s208_s16 = sshll.u32 %s354_s1, 4  ;;  %s207_s13 = int_to_ptr.vmem [resolvable:$true] %s206_s13  ;;  %s209_s16 = int_to_ptr.hbm [resolvable:$true] %s208_s16 }
   0x8   :  { %33 = vst [vmem:[#allocation1 + $0x10] ss:$2 sm:$0xff] %v26_v1 }
   0xe   :  { %v30_v2 = vld.sshfl [vmem:[#allocation1] sm:$0xff pattern:$0x75316420]  ;;  %v31_v3 = vld.sshfl [vmem:[#allocation1 + $0x8] sm:$0xff pattern:$0x75316420] }
   0xf   :  { %v41_v4 = vsel %vm40_vm0, %v30_v2, -inf  ;;  %v48_v5 = vsel %vm40_vm0, %v31_v3, -inf  ;;  %v34_v6 = vld.sshfl [vmem:[#allocation1 + $0x10] sm:$0xff pattern:$0x75316420] }
  0x10   :  { %v42_v7 = vrot.slane %v41_v4, 4  ;;  %v49_v8 = vrot.slane %v48_v5, 4  ;;  %v35_v9 = vld.sshfl [vmem:[#allocation1 + $0x18] sm:$0xff pattern:$0x75316420]  ;;  %v55_v10 = vsel %vm40_vm0, %v34_v6, -inf }
  0x11   :  { %v56_v11 = vrot.slane %v55_v10, 4  ;;  %v62_v12 = vsel %vm40_vm0, %v35_v9, -inf }
  0x12   :  { %v43_v13 = vmax.f32 %v41_v4, %v42_v7  ;;  %v50_v14 = vmax.f32 %v48_v5, %v49_v8  ;;  %v63_v15 = vrot.slane %v62_v12, 4 }
  0x13   :  { %v57_v16 = vmax.f32 %v55_v10, %v56_v11 }
  0x14   :  { %v44_v17 = vrot.slane %v43_v13, 2  ;;  %v51_v18 = vrot.slane %v50_v14, 2  ;;  %v64_v19 = vmax.f32 %v62_v12, %v63_v15 }
  0x15   :  { %v58_v20 = vrot.slane %v57_v16, 2 }
  0x16   :  { %v45_v21 = vmax.f32 %v43_v13, %v44_v17  ;;  %v52_v22 = vmax.f32 %v50_v14, %v51_v18  ;;  %v65_v23 = vrot.slane %v64_v19, 2 }
  0x17   :  { %v59_v24 = vmax.f32 %v57_v16, %v58_v20 }
  0x18   :  { %v46_v25 = vrot.slane %v45_v21, 1  ;;  %v53_v26 = vrot.slane %v52_v22, 1  ;;  %v66_v27 = vmax.f32 %v64_v19, %v65_v23 }
  0x19   :  { %v60_v29 = vrot.slane %v59_v24, 1 }
  0x1a   :  { %v54_v28 = vmax.f32 %v52_v22, %v53_v26  ;;  %v67_v30 = vrot.slane %v66_v27, 1  ;;  %v47_v31 = vmax.f32 %v45_v21, %v46_v25 }
  0x1b   :  { %v61_v35 = vmax.f32 %v59_v24, %v60_v29 }
  0x1c   :  { %v73_v32 = vrot.slane %v54_v28, 4  ;;  %v68_v33 = vmax.f32 %v66_v27, %v67_v30 }
  0x1e   :  { %v75_v34 = vsel %vm40_vm0, %v47_v31, %v73_v32  ;;  %v74_v36 = vrot.slane %v68_v33, 4 }
  0x1f   :  { %v79_v37 = vsub.f32 %v25_v0, %v75_v34 }
  0x20   :  { %v76_v38 = vsel %vm40_vm0, %v61_v35, %v74_v36 }
  0x21   :  { %v81_v39 = vmax.f32 %v79_v37, -12.0  ;;  %v80_v40 = vsub.f32 %v26_v1, %v76_v38 }
  0x23   :  { %v83_v41 = vmul.f32 1.442695, %v81_v39  ;;  %v82_v42 = vmax.f32 %v80_v40, -12.0 }
  0x25   :  { %225 = vpow2.f32 %v83_v41  ;;  %v85_v43 = vmul.f32 1.442695, %v82_v42 }
  0x27   :  { %227 = vpow2.f32 %v85_v43 }
  0x2b   :  { %v315_v44 = vpop.eup %225 }
  0x2c   :  { %89 = vst [vmem:[#allocation1] ss:$2 sm:$0xff] %v315_v44 }
  0x2d   :  { %v318_v45 = vpop.eup %227 }
  0x2e   :  { %93 = vst [vmem:[#allocation1 + $0x10] ss:$2 sm:$0xff] %v318_v45 }
  0x33   :  { %v90_v46 = vld.sshfl [vmem:[#allocation1] sm:$0xff pattern:$0x75316420]  ;;  %v91_v47 = vld.sshfl [vmem:[#allocation1 + $0x8] sm:$0xff pattern:$0x75316420] }
  0x34   :  { %v100_v48 = vsel %vm40_vm0, %v90_v46, 0.0  ;;  %v107_v49 = vsel %vm40_vm0, %v91_v47, 0.0 }
  0x35   :  { %v101_v50 = vrot.slane %v100_v48, 4  ;;  %v108_v51 = vrot.slane %v107_v49, 4  ;;  %v94_v52 = vld.sshfl [vmem:[#allocation1 + $0x10] sm:$0xff pattern:$0x75316420] }
  0x36   :  { %v95_v53 = vld.sshfl [vmem:[#allocation1 + $0x18] sm:$0xff pattern:$0x75316420]  ;;  %v114_v54 = vsel %vm40_vm0, %v94_v52, 0.0 }
  0x37   :  { %v102_v55 = vadd.f32 %v101_v50, %v100_v48  ;;  %v109_v56 = vadd.f32 %v108_v51, %v107_v49  ;;  %v115_v57 = vrot.slane %v114_v54, 4  ;;  %v121_v58 = vsel %vm40_vm0, %v95_v53, 0.0 }
  0x38   :  { %v122_v59 = vrot.slane %v121_v58, 4 }
  0x39   :  { %v103_v60 = vrot.slane %v102_v55, 2  ;;  %v110_v61 = vrot.slane %v109_v56, 2  ;;  %v116_v62 = vadd.f32 %v115_v57, %v114_v54 }
  0x3a   :  { %v123_v63 = vadd.f32 %v122_v59, %v121_v58 }
  0x3b   :  { %v104_v0 = vadd.f32 %v103_v60, %v102_v55  ;;  %v111_v1 = vadd.f32 %v110_v61, %v109_v56  ;;  %v117_v2 = vrot.slane %v116_v62, 2 }
  0x3c   :  { %v124_v3 = vrot.slane %v123_v63, 2 }
  0x3d   :  { %v105_v4 = vrot.slane %v104_v0, 1  ;;  %v112_v5 = vrot.slane %v111_v1, 1  ;;  %v118_v6 = vadd.f32 %v117_v2, %v116_v62 }
  0x3e   :  { %v125_v7 = vadd.f32 %v124_v3, %v123_v63 }
  0x3f   :  { %v106_v8 = vadd.f32 %v105_v4, %v104_v0  ;;  %v113_v9 = vadd.f32 %v112_v5, %v111_v1  ;;  %v119_v10 = vrot.slane %v118_v6, 1 }
  0x40   :  { %v126_v11 = vrot.slane %v125_v7, 1 }
  0x41   :  { %229 = vrcp.f32 %v106_v8  ;;  %v120_v12 = vadd.f32 %v119_v10, %v118_v6  ;;  %v137_v19 = vand.u32 2147483647, %v106_v8  ;;  %v139_v20 = vand.u32 2147483648, %v106_v8 }
  0x42   :  { %231 = vrcp.f32 %v113_v9  ;;  %v127_v13 = vadd.f32 %v126_v11, %v125_v7  ;;  %v152_v23 = vand.u32 2147483647, %v113_v9  ;;  %v154_v24 = vand.u32 2147483648, %v113_v9 }
  0x43   :  { %233 = vrcp.f32 %v120_v12  ;;  %vm133_vm1 = vweird.f32 %v106_v8  ;;  %vm148_vm3 = vweird.f32 %v113_v9  ;;  %vm325_vm5 = vcmp.eq.f32.partialorder %v137_v19, 8.507059e+37 }
  0x44   :  { %235 = vrcp.f32 %v127_v13  ;;  %v140_v32 = vor.u32 1.1754944e-38, %v139_v20  ;;  %vm153_vm7 = vcmp.eq.f32.partialorder %v152_v23, 8.507059e+37  ;;  %v155_v36 = vor.u32 1.1754944e-38, %v154_v24 }
  0x45   :  { %v182_v39 = vand.u32 2147483647, %v127_v13  ;;  %v184_v40 = vand.u32 2147483648, %v127_v13  ;;  %vm163_vm11 = vweird.f32 %v120_v12  ;;  %v169_v48 = vand.u32 2147483648, %v120_v12 }
  0x46   :  { %v167_v51 = vand.u32 2147483647, %v120_v12  ;;  %vm178_vm13 = vweird.f32 %v127_v13 }
  0x47   :  { %v230_v14 = vpop.eup %229  ;;  %v185_v54 = vor.u32 1.1754944e-38, %v184_v40  ;;  %vm183_vm15 = vcmp.eq.f32.partialorder %v182_v39, 8.507059e+37  ;;  %v170_v59 = vor.u32 1.1754944e-38, %v169_v48 }
  0x48   :  { %v232_v15 = vpop.eup %231  ;;  %v129_v16 = vmul.f32 %v230_v14, %v106_v8  ;;  %vm134_vm2 = vweird.f32 %v230_v14 }
  0x49   :  { %v144_v17 = vmul.f32 %v232_v15, %v113_v9  ;;  %v234_v21 = vpop.eup %233  ;;  %vm149_vm4 = vweird.f32 %v232_v15  ;;  %vm329_vm6 = vmor %vm133_vm1, %vm134_vm2  ;;  %vm168_vm1 = vcmp.eq.f32.partialorder %v167_v51, 8.507059e+37 }
  0x4a   :  { %v130_v18 = vsub.f32 1.0, %v129_v16  ;;  %v236_v25 = vpop.eup %235  ;;  %v159_v27 = vmul.f32 %v234_v21, %v120_v12  ;;  %vm150_vm8 = vmor %vm148_vm3, %vm149_vm4  ;;  %vm164_vm9 = vweird.f32 %v234_v21 }
  0x4b   :  { %v145_v22 = vsub.f32 1.0, %v144_v17  ;;  %v174_v29 = vmul.f32 %v236_v25, %v127_v13  ;;  %vm179_vm10 = vweird.f32 %v236_v25  ;;  %vm335_vm12 = vmor %vm163_vm11, %vm164_vm9 }
  0x4c   :  { %v131_v26 = vmul.f32 %v230_v14, %v130_v18  ;;  %v160_v33 = vsub.f32 1.0, %v159_v27  ;;  %vm180_vm14 = vmor %vm178_vm13, %vm179_vm10 }
  0x4d   :  { %v146_v28 = vmul.f32 %v232_v15, %v145_v22  ;;  %v175_v37 = vsub.f32 1.0, %v174_v29 }
  0x4e   :  { %v132_v30 = vadd.f32 %v230_v14, %v131_v26  ;;  %v161_v38 = vmul.f32 %v234_v21, %v160_v33 }
  0x4f   :  { %v147_v35 = vadd.f32 %v232_v15, %v146_v28  ;;  %v176_v43 = vmul.f32 %v236_v25, %v175_v37 }
  0x50   :  { %v136_v41 = vsel %vm329_vm6, %v230_v14, %v132_v30  ;;  %v162_v47 = vadd.f32 %v234_v21, %v161_v38 }
  0x51   :  { %v151_v42 = vsel %vm150_vm8, %v232_v15, %v147_v35  ;;  %v177_v52 = vadd.f32 %v236_v25, %v176_v43  ;;  %v141_v53 = vsel %vm325_vm5, %v140_v32, %v136_v41 }
  0x52   :  { %v156_v46 = vsel %vm153_vm7, %v155_v36, %v151_v42  ;;  %v166_v56 = vsel %vm335_vm12, %v234_v21, %v162_v47 }
  0x53   :  { %v192_v49 = vrot.slane %v156_v46, 4  ;;  %v181_v57 = vsel %vm180_vm14, %v236_v25, %v177_v52  ;;  %v171_v62 = vsel %vm168_vm1, %v170_v59, %v166_v56 }
  0x54   :  { %v186_v60 = vsel %vm183_vm15, %v185_v54, %v181_v57 }
  0x55   :  { %v194_v55 = vsel %vm40_vm0, %v141_v53, %v192_v49  ;;  %v193_v61 = vrot.slane %v186_v60, 4 }
  0x56   :  { %v198_v58 = vmul.f32 %v315_v44, %v194_v55 }
  0x57   :  { %v195_v63 = vsel %vm40_vm0, %v171_v62, %v193_v61 }
  0x58   :  { %200 = vst [vmem:[#allocation5] sm:$0xff] %v198_v58  ;;  %v199_v0 = vmul.f32 %v318_v45, %v195_v63 }
  0x5a   :  { %201 = vst [vmem:[#allocation5 + $0x8] sm:$0xff] %v199_v0 }
  0x5b   :  { %214 = dma.vmem_to_hbm [thread:$0]  %s207_s13, 256, %s209_s16, [#allocation4], %s290_s11, %s290_s11, %s291_s12  }
  0x5c   :  { %287 = dma.done.wait [#allocation4], 256  }
  0x5d   :  { %288 = vsyncadd [#allocation4], 4294967040 }
  0x5e   :  { %219 = vsyncpa [#allocation3], 1 }
  0x5f   :  { %220 = vsyncpa [#allocation4], 1 }

</bundles_post_ra>
